<compile_context>
chip_gen: v7x
topology: tpu7x:2x2x1
jax: 0.10.0
libtpu: 0.0.40
codegen_flags: <defaults>
</compile_context>

<pallas_src>
import functools

import jax
import jax.numpy as jnp
from jax.experimental import pallas as pl
from jax.experimental.pallas import tpu as pltpu


def _embed_pe_kernel(vocab, v_chunk, ids_ref, emb_ref, pe_ref, out_ref):
    """One grid step = one (Ts, D) slab of tokens from a single sequence.

    ids_ref : VMEM (1, Ts, 1) int32  -- this tile's token ids
    emb_ref : VMEM (V, D)            -- resident embedding table (single-buffered)
    pe_ref  : VMEM (Ts, D)           -- this tile's positional encodings (pipelined slab)
    out_ref : VMEM (1, Ts, D)        -- output slab (one unmasked HBM writeback per tile)
    """
    ids = ids_ref[0]                                     # (Ts, 1) int32
    ts = ids.shape[0]
    d = out_ref.shape[-1]

    acc = jnp.zeros((ts, d), jnp.float32)
    # One-hot gather on the (otherwise idle) MXU, chunked over the vocab (contraction) dim.
    # 128-wide chunks match the v5e MXU and keep <=16 live vregs for the one-hot on v6e/v7x.
    # TODO(synk): for very large vocabs switch this static Python loop to lax.fori_loop to
    #             bound code size (vocab is a compile-time constant here).
    for v0 in range(0, vocab, v_chunk):
        vc = min(v_chunk, vocab - v0)
        cols = jax.lax.broadcasted_iota(jnp.int32, (ts, vc), 1) + v0
        one_hot = (ids == cols).astype(jnp.float32)      # (Ts, vc), exact 0/1 -> gather is exact
        acc = acc + jnp.dot(one_hot, emb_ref[v0:v0 + vc, :],
                            preferred_element_type=jnp.float32)
    # NOTE: out-of-range token ids yield an all-zero one-hot row (zero embedding);
    # PyTorch nn.Embedding would raise instead of silently clamping/zeroing.
    out_ref[0] = (acc + pe_ref[...].astype(jnp.float32)).astype(out_ref.dtype)


def _vmem_capacity_bytes():
    """Generation-aware VMEM capacity query with a conservative (v7x per-TC) fallback."""
    try:
        cap = getattr(pltpu.get_tpu_info(), "vmem_capacity_bytes", None)
        if cap:
            return int(cap)
    except Exception:
        pass
    return 64 * 1024 * 1024


def input_processor_forward(input_ids, emb_table, pe, *, seq_tile=None):
    """input_ids: [B, S] int32, emb_table: [V, D] f32, pe: [MAX_SEQ, D] f32.
    Returns (embeddings [B, S, D] f32, input_ids [B, S] int32)."""
    B, S = input_ids.shape
    V, D = emb_table.shape
    P = pe.shape[0]

    # --- tiling: sequence tiles never cross a sequence boundary --------------------------
    if seq_tile is None:
        seq_tile = 128
    Ts = max(8, min((seq_tile // 8) * 8, ((S + 7) // 8) * 8))
    n_s = -(-S // Ts)                      # ceil
    S_pad = n_s * Ts

    ids_pad = input_ids.astype(jnp.int32)
    if S_pad != S:
        ids_pad = jnp.pad(ids_pad, ((0, 0), (0, S_pad - S)))
    ids_3d = ids_pad.reshape(B, S_pad, 1)  # ids ride the sublane axis -> (Ts, 1) blocks

    if P < S_pad:
        pe_used = jnp.pad(pe, ((0, S_pad - P), (0, 0)))
    else:
        pe_used = pe[:S_pad]
    pe_used = pe_used.astype(emb_table.dtype)

    # --- generation-aware VMEM budget -----------------------------------------------------
    itemsize = jnp.dtype(emb_table.dtype).itemsize
    table_bytes = V * D * itemsize                                # resident table, 1 buffer
    stream_bytes = 2 * (2 * Ts * D * itemsize + Ts * 4)           # pe + out + ids, 2 buffers
    footprint = table_bytes + stream_bytes + (2 << 20)            # + compiler scratch headroom
    cap = int(_vmem_capacity_bytes() * 0.9)
    if footprint > cap:
        # TODO(synk): fall back to a manually double-buffered HBM row gather
        #             (memory_space=pl.ANY + pltpu.make_async_copy) instead of erroring.
        raise ValueError(
            f"embedding table too large for the VMEM-resident path "
            f"({footprint} B needed, {cap} B per-core VMEM available)")
    # Extra table_bytes of slack in case the table ends up double-buffered (Buffered(1)
    # fallback); the limit is a budget, not an allocation, so slack is free.
    vmem_limit = int(min(max(footprint + table_bytes, 32 * 1024 * 1024), cap))

    # --- grid semantics: only go 2-TC parallel when there is enough work ------------------
    total_tiles = B * n_s
    dims = ("parallel", "parallel") if total_tiles >= 4 else ("arbitrary", "arbitrary")

    v_chunk = V if V <= 128 else 128

    def _emb_spec(single_buffer):
        if single_buffer:
            return pl.BlockSpec((V, D), lambda b, s: (0, 0),
                                pipeline_mode=pl.Buffered(1))
        return pl.BlockSpec((V, D), lambda b, s: (0, 0))

    def _run(single_buffer):
        return pl.pallas_call(
            functools.partial(_embed_pe_kernel, V, v_chunk),
            out_shape=jax.ShapeDtypeStruct((B, S_pad, D), emb_table.dtype),
            grid=(B, n_s),
            in_specs=[
                pl.BlockSpec((1, Ts, 1), lambda b, s: (b, s, 0)),   # token ids (this tile)
                _emb_spec(single_buffer),                           # resident embedding table
                pl.BlockSpec((Ts, D), lambda b, s: (s, 0)),         # PE slab (pipelined)
            ],
            out_specs=pl.BlockSpec((1, Ts, D), lambda b, s: (b, s, 0)),
            compiler_params=pltpu.CompilerParams(
                dimension_semantics=dims,
                vmem_limit_bytes=vmem_limit,
            ),
        )(ids_3d, emb_table, pe_used)

    try:
        out = _run(True)
    except Exception:
        # Older JAX versions may reject pipeline_mode=pl.Buffered(1); retry with the
        # default double-buffered table (identical results, 2x table residency).
        out = _run(False)

    embeddings = out[:, :S, :]
    return embeddings, input_ids


def make_positional_encoding(max_seq_len, embedding_dim):
    # Mirrors InputProcessor._create_positional_encoding (without the leading batch dim;
    # broadcasting over batch happens via the per-tile PE BlockSpec in the kernel).
    assert embedding_dim % 2 == 0, "sinusoidal PE requires an even embedding_dim"
    position = jnp.arange(max_seq_len, dtype=jnp.float32)[:, None]               # [L, 1]
    div_term = jnp.exp(jnp.arange(0, embedding_dim, 2, dtype=jnp.float32)
                       * (-(jnp.log(10000.0) / embedding_dim)))                  # [D/2]
    pe = jnp.zeros((max_seq_len, embedding_dim), dtype=jnp.float32)
    pe = pe.at[:, 0::2].set(jnp.sin(position * div_term))
    pe = pe.at[:, 1::2].set(jnp.cos(position * div_term))
    return pe


if __name__ == "__main__":
    VOCAB_SIZE = 64
    EMBED_DIM = 128
    MAX_SEQ_LEN = 16
    BATCH = 2
    SEQ_LEN = 8

    key = jax.random.PRNGKey(0)
    k_emb, k_ids = jax.random.split(key)

    # nn.Embedding default init: N(0, 1)
    emb_table = jax.random.normal(k_emb, (VOCAB_SIZE, EMBED_DIM), dtype=jnp.float32)
    pe = make_positional_encoding(MAX_SEQ_LEN, EMBED_DIM)
    input_ids = jax.random.randint(k_ids, (BATCH, SEQ_LEN), 0, VOCAB_SIZE, dtype=jnp.int32)

    embeddings, out_ids = input_processor_forward(input_ids, emb_table, pe)
    embeddings = jax.block_until_ready(embeddings)
    out_ids = jax.block_until_ready(out_ids)

    # Pure-JAX reference check (one-hot MXU gather + PE add is bit-exact vs. the gather).
    ref = emb_table[input_ids] + pe[None, :SEQ_LEN, :]
    assert embeddings.shape == (BATCH, SEQ_LEN, EMBED_DIM)
    assert out_ids.shape == (BATCH, SEQ_LEN)
    assert jnp.allclose(embeddings, ref, atol=1e-6), "mismatch vs reference"
    assert jnp.array_equal(out_ids, input_ids)

    print("KERNEL_OK")
</pallas_src>

<mosaic_0001>
module attributes {stable_mosaic.version = 11 : i64} {
  func.func @_embed_pe_kernel(%arg0: i32, %arg1: i32, %arg2: memref<1x8x1xi32, #tpu.memory_space<vmem>>, %arg3: memref<64x128xf32, #tpu.memory_space<vmem>>, %arg4: memref<8x128xf32, #tpu.memory_space<vmem>>, %arg5: memref<1x8x128xf32, #tpu.memory_space<vmem>>) attributes {dimension_semantics = [#tpu.dimension_semantics<arbitrary>, #tpu.dimension_semantics<arbitrary>], iteration_bounds = array<i64: 2, 1>, scalar_prefetch = 0 : i64, scratch_operands = 0 : i64, tpu.core_type = #tpu.core_type<tc>, window_params = [{transform_indices = @transform_0, window_bounds = array<i64: 1, 8, 1>}, {pipeline_mode = #tpu.pipeline_mode<synchronous>, transform_indices = @transform_1, window_bounds = array<i64: 64, 128>}, {transform_indices = @transform_2, window_bounds = array<i64: 8, 128>}, {transform_indices = @transform_3, window_bounds = array<i64: 1, 8, 128>}]} {
    %c0 = arith.constant 0 : index
    %c0_0 = arith.constant 0 : index
    %c0_1 = arith.constant 0 : index
    %0 = vector.load %arg2[%c0, %c0_0, %c0_1] : memref<1x8x1xi32, #tpu.memory_space<vmem>>, vector<1x8x1xi32>
    %1 = vector.shape_cast %0 : vector<1x8x1xi32> to vector<8x1xi32>
    %cst = arith.constant 0.000000e+00 : f32
    %2 = vector.broadcast %cst : f32 to vector<8x128xf32>
    %3 = tpu.iota {dimensions = array<i32: 1>} : vector<8x64xi32>
    %c0_i32 = arith.constant 0 : i32
    %4 = vector.broadcast %c0_i32 : i32 to vector<8x64xi32>
    %5 = arith.addi %3, %4 : vector<8x64xi32>
    %6 = vector.broadcast %1 : vector<8x1xi32> to vector<8x64xi32>
    %7 = arith.cmpi eq, %6, %5 : vector<8x64xi32>
    %8 = arith.extui %7 : vector<8x64xi1> to vector<8x64xi32>
    %9 = arith.sitofp %8 : vector<8x64xi32> to vector<8x64xf32>
    %c0_2 = arith.constant 0 : index
    %c0_3 = arith.constant 0 : index
    %10 = vector.load %arg3[%c0_2, %c0_3] : memref<64x128xf32, #tpu.memory_space<vmem>>, vector<64x128xf32>
    %cst_4 = arith.constant dense<0.000000e+00> : vector<8x128xf32>
    %11 = tpu.matmul %9, %10, %cst_4 {dimension_numbers = #tpu.dot_dimension_numbers<[1], [0], [0], [1], [0, 0, 1, 1], [], []>} : vector<8x64xf32>, vector<64x128xf32>, vector<8x128xf32> -> vector<8x128xf32>
    %12 = arith.addf %2, %11 : vector<8x128xf32>
    %c0_5 = arith.constant 0 : index
    %c0_6 = arith.constant 0 : index
    %13 = vector.load %arg4[%c0_5, %c0_6] : memref<8x128xf32, #tpu.memory_space<vmem>>, vector<8x128xf32>
    %14 = arith.addf %12, %13 : vector<8x128xf32>
    %c0_7 = arith.constant 0 : index
    %c0_8 = arith.constant 0 : index
    %c0_9 = arith.constant 0 : index
    %15 = vector.load %arg5[%c0_7, %c0_8, %c0_9] : memref<1x8x128xf32, #tpu.memory_space<vmem>>, vector<1x8x128xf32>
    %16 = vector.shape_cast %15 : vector<1x8x128xf32> to vector<8x128xf32>
    %17 = vector.shape_cast %14 : vector<8x128xf32> to vector<1x8x128xf32>
    tpu.vector_store %arg5[%c0_7, %c0_8, %c0_9], %17 {strides = array<i32>} : memref<1x8x128xf32, #tpu.memory_space<vmem>>, vector<1x8x128xf32>,
    return
  }
  func.func @transform_0(%arg0: i32, %arg1: i32) -> (i32, i32, i32) {
    %c0_i32 = arith.constant 0 : i32
    %c0_i32_0 = arith.constant 0 : i32
    return %arg0, %arg1, %c0_i32 : i32, i32, i32
  }
  func.func @transform_1(%arg0: i32, %arg1: i32) -> (i32, i32) {
    %c0_i32 = arith.constant 0 : i32
    %c0_i32_0 = arith.constant 0 : i32
    %c0_i32_1 = arith.constant 0 : i32
    return %c0_i32, %c0_i32_0 : i32, i32
  }
  func.func @transform_2(%arg0: i32, %arg1: i32) -> (i32, i32) {
    %c0_i32 = arith.constant 0 : i32
    %c0_i32_0 = arith.constant 0 : i32
    return %arg1, %c0_i32 : i32, i32
  }
  func.func @transform_3(%arg0: i32, %arg1: i32) -> (i32, i32, i32) {
    %c0_i32 = arith.constant 0 : i32
    %c0_i32_0 = arith.constant 0 : i32
    return %arg0, %arg1, %c0_i32 : i32, i32, i32
  }
}

module attributes {stable_mosaic.version = 11 : i64} {
  func.func @_embed_pe_kernel(%arg0: i32, %arg1: i32, %arg2: memref<1x8x1xi32, #tpu.memory_space<vmem>>, %arg3: memref<64x128xf32, #tpu.memory_space<vmem>>, %arg4: memref<8x128xf32, #tpu.memory_space<vmem>>, %arg5: memref<1x8x128xf32, #tpu.memory_space<vmem>>) attributes {dimension_semantics = [#tpu.dimension_semantics<arbitrary>, #tpu.dimension_semantics<arbitrary>], iteration_bounds = array<i64: 2, 1>, scalar_prefetch = 0 : i64, scratch_operands = 0 : i64, tpu.core_type = #tpu.core_type<tc>, window_params = [{transform_indices = @transform_0, window_bounds = array<i64: 1, 8, 1>}, {pipeline_mode = #tpu.pipeline_mode<synchronous>, transform_indices = @transform_1, window_bounds = array<i64: 64, 128>}, {transform_indices = @transform_2, window_bounds = array<i64: 8, 128>}, {transform_indices = @transform_3, window_bounds = array<i64: 1, 8, 128>}]} {
    %c0 = arith.constant 0 : index
    %c0_0 = arith.constant 0 : index
    %c0_1 = arith.constant 0 : index
    %0 = vector.load %arg2[%c0, %c0_0, %c0_1] : memref<1x8x1xi32, #tpu.memory_space<vmem>>, vector<1x8x1xi32>
    %1 = vector.shape_cast %0 : vector<1x8x1xi32> to vector<8x1xi32>
    %cst = arith.constant 0.000000e+00 : f32
    %2 = vector.broadcast %cst : f32 to vector<8x128xf32>
    %3 = tpu.iota {dimensions = array<i32: 1>} : vector<8x64xi32>
    %c0_i32 = arith.constant 0 : i32
    %4 = vector.broadcast %c0_i32 : i32 to vector<8x64xi32>
    %5 = arith.addi %3, %4 : vector<8x64xi32>
    %6 = vector.broadcast %1 : vector<8x1xi32> to vector<8x64xi32>
    %7 = arith.cmpi eq, %6, %5 : vector<8x64xi32>
    %8 = arith.extui %7 : vector<8x64xi1> to vector<8x64xi32>
    %9 = arith.sitofp %8 : vector<8x64xi32> to vector<8x64xf32>
    %c0_2 = arith.constant 0 : index
    %c0_3 = arith.constant 0 : index
    %10 = vector.load %arg3[%c0_2, %c0_3] : memref<64x128xf32, #tpu.memory_space<vmem>>, vector<64x128xf32>
    %cst_4 = arith.constant dense<0.000000e+00> : vector<8x128xf32>
    %11 = tpu.matmul %9, %10, %cst_4 {dimension_numbers = #tpu.dot_dimension_numbers<[1], [0], [0], [1], [0, 0, 1, 1], [], []>} : vector<8x64xf32>, vector<64x128xf32>, vector<8x128xf32> -> vector<8x128xf32>
    %12 = arith.addf %2, %11 : vector<8x128xf32>
    %c0_5 = arith.constant 0 : index
    %c0_6 = arith.constant 0 : index
    %13 = vector.load %arg4[%c0_5, %c0_6] : memref<8x128xf32, #tpu.memory_space<vmem>>, vector<8x128xf32>
    %14 = arith.addf %12, %13 : vector<8x128xf32>
    %c0_7 = arith.constant 0 : index
    %c0_8 = arith.constant 0 : index
    %c0_9 = arith.constant 0 : index
    %15 = vector.load %arg5[%c0_7, %c0_8, %c0_9] : memref<1x8x128xf32, #tpu.memory_space<vmem>>, vector<1x8x128xf32>
    %16 = vector.shape_cast %15 : vector<1x8x128xf32> to vector<8x128xf32>
    %17 = vector.shape_cast %14 : vector<8x128xf32> to vector<1x8x128xf32>
    tpu.vector_store %arg5[%c0_7, %c0_8, %c0_9], %17 {strides = array<i32>} : memref<1x8x128xf32, #tpu.memory_space<vmem>>, vector<1x8x128xf32>,
    return
  }
  func.func @transform_0(%arg0: i32, %arg1: i32) -> (i32, i32, i32) {
    %c0_i32 = arith.constant 0 : i32
    %c0_i32_0 = arith.constant 0 : i32
    return %arg0, %arg1, %c0_i32 : i32, i32, i32
  }
  func.func @transform_1(%arg0: i32, %arg1: i32) -> (i32, i32) {
    %c0_i32 = arith.constant 0 : i32
    %c0_i32_0 = arith.constant 0 : i32
    %c0_i32_1 = arith.constant 0 : i32
    return %c0_i32, %c0_i32_0 : i32, i32
  }
  func.func @transform_2(%arg0: i32, %arg1: i32) -> (i32, i32) {
    %c0_i32 = arith.constant 0 : i32
    %c0_i32_0 = arith.constant 0 : i32
    return %arg1, %c0_i32 : i32, i32
  }
  func.func @transform_3(%arg0: i32, %arg1: i32) -> (i32, i32, i32) {
    %c0_i32 = arith.constant 0 : i32
    %c0_i32_0 = arith.constant 0 : i32
    return %arg0, %arg1, %c0_i32 : i32, i32, i32
  }
}

</mosaic_0001>

<bundles_post_ra>
// kernel: tpu_custom_call.1
= control target key start
LH: loop header
LB: loop body
LE: loop exit
PB: predicated region body
PF: predicated region fallthrough
CT: control target
= control target key end

     0   :  { %8 = vsyncpa [#allocation3], 0  ;;  %s851_s0 = inlined_call_operand.vmem [shape: s32[2,8,1], index: 0, kind: input, shape index: {}]   ;;  %s852_s1 = inlined_call_operand.hbm [shape: f32[64,128], index: 1, kind: input, shape index: {}]   ;;  %s853_s2 = inlined_call_operand.vmem [shape: f32[8,128], index: 2, kind: input, shape index: {}]   ;;  %s854_s3 = inlined_call_operand.hbm [shape: f32[2,8,128], index: 3, kind: output, shape index: {}]  }
   0x1   :  { %9 = vsyncpa [#allocation4], 0 }
   0x2   :  { %11 = vsyncpa [#allocation4 + $0x1], 0  ;;  %s698_s12 = smov 0   ;;  %s700_s13 = smov 0  }
   0x3   :  { %s702_s14 = smov 0   ;;  %s704_s15 = smov 0  }
   0x4   :  { %s706_s16 = smov 0   ;;  %s708_s17 = smov 0  }
   0x5 LB: > { %s429_s18 = sadd.s32 4294967295, %s668_s17   ;;  %s430_s19 = sadd.s32 4294967294, %s668_s17   ;;  %s668_s17 = sphi %s708_s17, %s17_s17   ;;  %s664_s16 = sphi %s706_s16, %s872_s16   ;;  %s660_s15 = sphi %s704_s15, %s871_s15   ;;  %s656_s14 = sphi %s702_s14, %s870_s14   ;;  %s652_s13 = sphi %s700_s13, %s869_s13   ;;  %s648_s12 = sphi %s698_s12, %s868_s12  }
   0x6   : > { %s29_s20 = sadd.s32 1, %s664_s16  ;;  %s113_s21 = sadd.s32 1, %s656_s14 }
   0x7   : > { %p31_p0 = scmp.ge.s32.totalorder %s29_s20, 2  ;;  %p123_p1 = scmp.ne.s32.totalorder %s656_s14, %s652_s13 }
   0x8   : > { %p124_p2 = scmp.eq.s32.totalorder %s429_s18, 1  ;;  %p129_p3 = scmp.ne.s32.totalorder %s652_s13, %s648_s12 }
   0x9   : > { %s874_s20 = smov (%p31_p0, %s29_s20), 0  ;;  %p130_p5 = scmp.eq.s32.totalorder %s430_s19, 1 }
   0xa   : > { %p738_p4 = por %p124_p2, %p123_p1  ;;  %s108_s23 = ssub.s32 %s664_s16, %s874_s20 }
   0xb   : > { %p431_p6 = scmp.ge.s32.totalorder %s668_s17, 1  ;;  %p111_p7 = scmp.eq.s32.totalorder %s108_s23, 0 }
   0xc   : > { %s859_s22 = scalar_select %p738_p4, 1, 0 }
   0xd   : > { %p745_p8 = por %p130_p5, %p129_p3  ;;  %p137_p9 = scmp.lt.s32.totalorder %s668_s17, 3 }
   0xe   : > { %s751_s25 = scalar_select %p111_p7, %s656_s14, %s113_s21  }
   0xf   : > { %s860_s24 = scalar_select %p745_p8, 1, 0 }
  0x10   : > { %p753_p10 = pnand %p431_p6, %p137_p9  ;;  %p757_p11 = scmp.eq.s32.totalorder %s429_s18, 0 }
  0x11   : > { %s670_s28 = smov [#allocation2]   ;;  %s558_s6 = scalar_lea.hbm %s852_s1, 1024 }
  0x12   : > { %s861_s26 = scalar_select %p753_p10, 1, 0 }
  0x13   : > { %s862_s27 = scalar_select %p757_p11, 1, 0 }
  0x14   : > { %p491_p12 = pneg %p753_p10  ;;  %s149_s29 = sshll.u32 %s670_s28, 4  ;;  %s150_s29 = int_to_ptr.vmem [resolvable:$true] %s149_s29 }
  0x15   : > { %p559_p0 = scmp.ne.s32.totalorder %s852_s1, %s558_s6  ;;  %p565_p5 = scmp.lt.u32.totalorder %s558_s6, %s852_s1 }
  0x16   : > { %p765_p13 = pnand %p757_p11, %p491_p12 }
  0x18   : > { %p560_p1 = pneg %p765_p13 }
  0x1a   : > { %p561_p2 = pnand %p560_p1, %p559_p0 }
  0x1c   : > { %p562_p3 = pneg %p561_p2 }
  0x1e   : > { %p567_p6 = pnand %p565_p5, %p562_p3 }
  0x20   : > { %570 = shalt.err (!%p567_p6)
}
  0x21   : > { %s571_s11 = scalar_lea.vmem %s150_s29, 1024  ;;  %p579_p8 = scmp.lt.s32.totalorder %s150_s29, %s150_s29 }
  0x22   : > { %p572_p7 = scmp.ne.s32.totalorder %s150_s29, %s571_s11  ;;  %p580_p4 = scmp.lt.s32.totalorder %s571_s11, %s571_s11 }
  0x24   : > { %p574_p9 = pnand %p572_p7, %p560_p1  ;;  %p581_p11 = por %p580_p4, %p579_p8 }
  0x26   : > { %p575_p12 = pneg %p574_p9 }
  0x28   : > { %p582_p10 = pnand %p581_p11, %p575_p12 }
  0x2a   : > { %585 = shalt.err (!%p582_p10)
}
  0x2b   : > { %s671_s18 = smov 128   ;;  %s672_s19 = smov 8  }
  0x2c   : > { %494 = dma.hbm_to_vmem [thread:$0]  (!%p765_p13), %s852_s1, 1024, %s150_s29, [#allocation3], %s671_s18, %s671_s18, %s672_s19  }
  0x2d   : > { %p864_p0 = scmp.ne.s32.totalorder %s861_s26, 0 }
  0x2e   : > { %p865_p2 = scmp.ne.s32.totalorder (!%p864_p0), %s862_s27, 0 }
  0x2f   : > { %182 = sbr.rel (%p864_p0) target bundleno = 420 (0x1a4), region = 32 }
  0x36   : > { %639 = dma.done.wait (%p865_p2), [#allocation3], 1024  }
  0x37   : > { %641 = vsyncadd (%p865_p2), [#allocation3], 4294966272  ;;  %p212_p4 = scmp.lt.s32.totalorder %s660_s15, 1  ;;  %v673_v0 = vmov 0   ;;  %v674_v1 = vmov 0.0|0.0   ;;  %v232_v3 = vld [vmem:[#allocation2] sm:$0xff]  ;;  %v224_v16 = vlaneseq }
  0x38   : > { %557 = vset.pattern.permute.xlu0 %v673_v0  ;;  %473 = vmatprep.subr.bf16.mxu0 %v674_v1  ;;  %v233_v4 = vld [vmem:[#allocation2 + $0x8] sm:$0xff]  ;;  %v234_v6 = vld [vmem:[#allocation2 + $0x10] sm:$0xff]  ;;  %v235_v7 = vld [vmem:[#allocation2 + $0x18] sm:$0xff]  ;;  %vm675_vm0 = vmmov 0   ;;  %v676_v8 = vmov 0.0   ;;  %vm241_vm1 = vcmask 523264  }
  0x39   : > { %s213_s28 = scalar_select %p212_p4, %s660_s15, 1  ;;  %v474_v5 = vpack.c.bf16 %v233_v4, %v232_v3  ;;  %470 = vmatprep.mubr.msk.f32.mxu0 %vm675_vm0, %v676_v8  ;;  %v477_v9 = vpack.c.bf16 %v235_v7, %v234_v6  ;;  %v236_v10 = vld [vmem:[#allocation2 + $0x20] sm:$0xff]  ;;  %v237_v11 = vld [vmem:[#allocation2 + $0x28] sm:$0xff]  ;;  %v238_v13 = vld [vmem:[#allocation2 + $0x30] sm:$0xff]  ;;  %v225_v17 = vand.u32 127, %v224_v16 }
  0x3a   : > { %v480_v12 = vpack.c.bf16 %v237_v11, %v236_v10  ;;  %v239_v14 = vld [vmem:[#allocation2 + $0x38] sm:$0xff]  ;;  %s209_s27 = sand.u32 1, %s652_s13   ;;  %v240_v20 = vld [vmem:[%s853_s2] sm:$0xff]  ;;  %s442_s8 = sshll.u32 %s660_s15, 7 }
  0x3b   : > { %s438_s30 = sshll.u32 %s213_s28, 3  ;;  %475 = vmatpush3.bf16.msra.mxu0 %v474_v5  ;;  %v483_v15 = vpack.c.bf16 %v239_v14, %v238_v13  ;;  %s437_s5 = sshll.u32 %s209_s27, 3 }
  0x3c   : > { %s218_s26 = scalar_lea.vmem %s851_s0, %s438_s30  ;;  %476 = vmatprep.subr.bf16.mxu0 %v674_v1  ;;  %s211_s9 = scalar_lea.vmem [#allocation5], %s437_s5 }
  0x3d   : > { %v223_v2 = vld [vmem:[%s218_s26] sm:$0xff]  ;;  %s331_s10 = sshll.u32 %s211_s9, 4  ;;  %s804_s19 = scalar_lea.hbm %s854_s3, %s442_s8  ;;  %s806_s10 = int_to_ptr.vmem [resolvable:$true] %s331_s10 }
  0x3e   : > { %227 = vperm.xlu0 %557, %v223_v2   ;;  %s317_s21 = scalar_lea.sflag [#allocation4], %s209_s27  ;;  %s586_s23 = scalar_lea.vmem %s806_s10, 128 }
  0x3f   : > { %478 = vmatpush3.bf16.msra.mxu0 %v477_v9  ;;  %p587_p8 = scmp.ne.s32.totalorder %s806_s10, %s586_s23  ;;  %p866_p10 = scmp.ne.s32.totalorder %s859_s22, 0 }
  0x40   : > { %479 = vmatprep.subr.bf16.mxu0 %v674_v1  ;;  %s677_s15 = smov [#allocation5]  }
  0x41   : > { %p588_p11 = pnand %p587_p8, %p866_p10  ;;  %s590_s28 = sshll.u32 %s677_s15, 4  ;;  %s591_s28 = int_to_ptr.vmem [resolvable:$false] %s590_s28 }
  0x42   : > { %s592_s30 = scalar_lea.vmem %s591_s28, 256  ;;  %p593_p1 = scmp.lt.s32.totalorder %s806_s10, %s591_s28 }
  0x43   : > { %481 = vmatpush3.bf16.msra.mxu0 %v480_v12  ;;  %p589_p13 = pneg %p588_p11  ;;  %p594_p3 = scmp.lt.s32.totalorder %s592_s30, %s586_s23 }
  0x44   : > { %482 = vmatprep.subr.bf16.mxu0 %v674_v1 }
  0x45   : > { %p595_p5 = por %p594_p3, %p593_p1 }
  0x47   : > { %484 = vmatpush3.bf16.msra.mxu0 %v483_v15  ;;  %p596_p6 = pnand %p595_p5, %p589_p13 }
  0xbd   : > { %v228_v18 = vpop.permute.xlu0 %227 }
  0xbe   : > { %vm229_vm2 = vcmp.eq.s32.totalorder %v228_v18, %v225_v17 }
  0xbf   : > { %v439_v19 = vsel %vm229_vm2, 1.0, %v676_v8 }
  0xc0   : > { %471 = vmatmul.mubr.msk.f32.vlgmr.msra.gmra.mrb[0].mxu0 %vm241_vm1, %v439_v19 }
 0x193   : > { %v311_v21 = vpop.f32.mrb[0].mxu0 }
 0x194   : > { %v312_v22 = vadd.f32 %v311_v21, %v240_v20  ;;  %v472_v23 = vpop.f32.mrb[1].mxu0 }
 0x196   : > { %315 = vst [vmem:[%s211_s9] sm:$0xff] %v312_v22 }
 0x197   : > { %599 = shalt.err (!%p596_p6)
}
 0x198   : > { %s600_s4 = scalar_lea.hbm %s804_s19, 128  ;;  %s604_s27 = scalar_lea.hbm %s854_s3, 256 }
 0x199   : > { %p601_p7 = scmp.ne.s32.totalorder %s804_s19, %s600_s4  ;;  %p605_p0 = scmp.lt.u32.totalorder %s804_s19, %s854_s3 }
 0x19a   : > { %p606_p2 = scmp.lt.u32.totalorder %s604_s27, %s600_s4  ;;  %p608_p8 = scmp.lt.u32.totalorder %s600_s4, %s804_s19 }
 0x19b   : > { %p602_p9 = pnand %p601_p7, %p866_p10 }
 0x19c   : > { %p607_p4 = por %p606_p2, %p605_p0 }
 0x19d   : > { %p603_p12 = pneg %p602_p9 }
 0x19e   : > { %p609_p11 = por %p608_p8, %p607_p4 }
 0x1a0   : > { %p610_p13 = pnand %p609_p11, %p603_p12 }
 0x1a2   : > { %613 = shalt.err (!%p610_p13)
}
 0x1a3   : > { %489 = dma.vmem_to_hbm [thread:$0]  (%p866_p10), %s806_s10, 128, %s804_s19, %s317_s21  }
 0x1a4 PF: > { %p501_p1 = scmp.ge.s32.totalorder %s668_s17, 2  ;;  %s343_s7 = sand.u32 1, %s648_s12  }
 0x1a5   : > { %p867_p3 = scmp.ne.s32.totalorder %s860_s24, 0  ;;  %s344_s8 = scalar_lea.sflag [#allocation4], %s343_s7 }
 0x1a7   : > { %p496_p5 = pnand %p501_p1, %p867_p3 }
 0x1a9   : > { %643 = dma.done.wait (!%p496_p5), %s344_s8, 128  }
 0x1aa   : > { %645 = vsyncadd (!%p496_p5), %s344_s8, 4294967168  ;;  %s17_s17 = sadd.s32 1, %s668_s17   ;;  %s868_s12 = smov %s652_s13 }
 0x1ab   : > { %p14_p6 = scmp.ge.s32.totalorder %s17_s17, 4   ;;  %s869_s13 = smov %s656_s14 }
 0x1ac   : > { %s870_s14 = smov %s751_s25  ;;  %s871_s15 = smov %s664_s16 }
 0x1ad   : > { %s872_s16 = smov %s874_s20  ;;  %16 = sbr.rel (!%p14_p6) target bundleno = 5 (0x5), region = 75 }
 0x1b4   :  { %349 = vsyncpa [#allocation3], 1 }
 0x1b5   :  { %351 = vsyncpa [#allocation3 + $0x1], 1 }
 0x1b6   :  { %352 = vsyncpa [#allocation4], 1 }
 0x1b7   :  { %354 = vsyncpa [#allocation4 + $0x1], 1 }

// kernel: tpu_custom_call.1
= control target key start
LH: loop header
LB: loop body
LE: loop exit
PB: predicated region body
PF: predicated region fallthrough
CT: control target
= control target key end

     0   :  { %8 = vsyncpa [#allocation3], 0  ;;  %s851_s0 = inlined_call_operand.vmem [shape: s32[2,8,1], index: 0, kind: input, shape index: {}]   ;;  %s852_s1 = inlined_call_operand.hbm [shape: f32[64,128], index: 1, kind: input, shape index: {}]   ;;  %s853_s2 = inlined_call_operand.vmem [shape: f32[8,128], index: 2, kind: input, shape index: {}]   ;;  %s854_s3 = inlined_call_operand.hbm [shape: f32[2,8,128], index: 3, kind: output, shape index: {}]  }
   0x1   :  { %9 = vsyncpa [#allocation4], 0 }
   0x2   :  { %11 = vsyncpa [#allocation4 + $0x1], 0  ;;  %s698_s12 = smov 0   ;;  %s700_s13 = smov 0  }
   0x3   :  { %s702_s14 = smov 0   ;;  %s704_s15 = smov 0  }
   0x4   :  { %s706_s16 = smov 0   ;;  %s708_s17 = smov 0  }
   0x5 LB: > { %s429_s18 = sadd.s32 4294967295, %s668_s17   ;;  %s430_s19 = sadd.s32 4294967294, %s668_s17   ;;  %s668_s17 = sphi %s708_s17, %s17_s17   ;;  %s664_s16 = sphi %s706_s16, %s872_s16   ;;  %s660_s15 = sphi %s704_s15, %s871_s15   ;;  %s656_s14 = sphi %s702_s14, %s870_s14   ;;  %s652_s13 = sphi %s700_s13, %s869_s13   ;;  %s648_s12 = sphi %s698_s12, %s868_s12  }
   0x6   : > { %s29_s20 = sadd.s32 1, %s664_s16  ;;  %s113_s21 = sadd.s32 1, %s656_s14 }
   0x7   : > { %p31_p0 = scmp.ge.s32.totalorder %s29_s20, 2  ;;  %p123_p1 = scmp.ne.s32.totalorder %s656_s14, %s652_s13 }
   0x8   : > { %p124_p2 = scmp.eq.s32.totalorder %s429_s18, 1  ;;  %p129_p3 = scmp.ne.s32.totalorder %s652_s13, %s648_s12 }
   0x9   : > { %s874_s20 = smov (%p31_p0, %s29_s20), 0  ;;  %p130_p5 = scmp.eq.s32.totalorder %s430_s19, 1 }
   0xa   : > { %p738_p4 = por %p124_p2, %p123_p1  ;;  %s108_s23 = ssub.s32 %s664_s16, %s874_s20 }
   0xb   : > { %p431_p6 = scmp.ge.s32.totalorder %s668_s17, 1  ;;  %p111_p7 = scmp.eq.s32.totalorder %s108_s23, 0 }
   0xc   : > { %s859_s22 = scalar_select %p738_p4, 1, 0 }
   0xd   : > { %p745_p8 = por %p130_p5, %p129_p3  ;;  %p137_p9 = scmp.lt.s32.totalorder %s668_s17, 3 }
   0xe   : > { %s751_s25 = scalar_select %p111_p7, %s656_s14, %s113_s21  }
   0xf   : > { %s860_s24 = scalar_select %p745_p8, 1, 0 }
  0x10   : > { %p753_p10 = pnand %p431_p6, %p137_p9  ;;  %p757_p11 = scmp.eq.s32.totalorder %s429_s18, 0 }
  0x11   : > { %s670_s28 = smov [#allocation2]   ;;  %s558_s6 = scalar_lea.hbm %s852_s1, 1024 }
  0x12   : > { %s861_s26 = scalar_select %p753_p10, 1, 0 }
  0x13   : > { %s862_s27 = scalar_select %p757_p11, 1, 0 }
  0x14   : > { %p491_p12 = pneg %p753_p10  ;;  %s149_s29 = sshll.u32 %s670_s28, 4  ;;  %s150_s29 = int_to_ptr.vmem [resolvable:$true] %s149_s29 }
  0x15   : > { %p559_p0 = scmp.ne.s32.totalorder %s852_s1, %s558_s6  ;;  %p565_p5 = scmp.lt.u32.totalorder %s558_s6, %s852_s1 }
  0x16   : > { %p765_p13 = pnand %p757_p11, %p491_p12 }
  0x18   : > { %p560_p1 = pneg %p765_p13 }
  0x1a   : > { %p561_p2 = pnand %p560_p1, %p559_p0 }
  0x1c   : > { %p562_p3 = pneg %p561_p2 }
  0x1e   : > { %p567_p6 = pnand %p565_p5, %p562_p3 }
  0x20   : > { %570 = shalt.err (!%p567_p6)
}
  0x21   : > { %s571_s11 = scalar_lea.vmem %s150_s29, 1024  ;;  %p579_p8 = scmp.lt.s32.totalorder %s150_s29, %s150_s29 }
  0x22   : > { %p572_p7 = scmp.ne.s32.totalorder %s150_s29, %s571_s11  ;;  %p580_p4 = scmp.lt.s32.totalorder %s571_s11, %s571_s11 }
  0x24   : > { %p574_p9 = pnand %p572_p7, %p560_p1  ;;  %p581_p11 = por %p580_p4, %p579_p8 }
  0x26   : > { %p575_p12 = pneg %p574_p9 }
  0x28   : > { %p582_p10 = pnand %p581_p11, %p575_p12 }
  0x2a   : > { %585 = shalt.err (!%p582_p10)
}
  0x2b   : > { %s671_s18 = smov 128   ;;  %s672_s19 = smov 8  }
  0x2c   : > { %494 = dma.hbm_to_vmem [thread:$0]  (!%p765_p13), %s852_s1, 1024, %s150_s29, [#allocation3], %s671_s18, %s671_s18, %s672_s19  }
  0x2d   : > { %p864_p0 = scmp.ne.s32.totalorder %s861_s26, 0 }
  0x2e   : > { %p865_p2 = scmp.ne.s32.totalorder (!%p864_p0), %s862_s27, 0 }
  0x2f   : > { %182 = sbr.rel (%p864_p0) target bundleno = 420 (0x1a4), region = 32 }
  0x36   : > { %639 = dma.done.wait (%p865_p2), [#allocation3], 1024  }
  0x37   : > { %641 = vsyncadd (%p865_p2), [#allocation3], 4294966272  ;;  %p212_p4 = scmp.lt.s32.totalorder %s660_s15, 1  ;;  %v673_v0 = vmov 0   ;;  %v674_v1 = vmov 0.0|0.0   ;;  %v232_v3 = vld [vmem:[#allocation2] sm:$0xff]  ;;  %v224_v16 = vlaneseq }
  0x38   : > { %557 = vset.pattern.permute.xlu0 %v673_v0  ;;  %473 = vmatprep.subr.bf16.mxu0 %v674_v1  ;;  %v233_v4 = vld [vmem:[#allocation2 + $0x8] sm:$0xff]  ;;  %v234_v6 = vld [vmem:[#allocation2 + $0x10] sm:$0xff]  ;;  %v235_v7 = vld [vmem:[#allocation2 + $0x18] sm:$0xff]  ;;  %vm675_vm0 = vmmov 0   ;;  %v676_v8 = vmov 0.0   ;;  %vm241_vm1 = vcmask 523264  }
  0x39   : > { %s213_s28 = scalar_select %p212_p4, %s660_s15, 1  ;;  %v474_v5 = vpack.c.bf16 %v233_v4, %v232_v3  ;;  %470 = vmatprep.mubr.msk.f32.mxu0 %vm675_vm0, %v676_v8  ;;  %v477_v9 = vpack.c.bf16 %v235_v7, %v234_v6  ;;  %v236_v10 = vld [vmem:[#allocation2 + $0x20] sm:$0xff]  ;;  %v237_v11 = vld [vmem:[#allocation2 + $0x28] sm:$0xff]  ;;  %v238_v13 = vld [vmem:[#allocation2 + $0x30] sm:$0xff]  ;;  %v225_v17 = vand.u32 127, %v224_v16 }
  0x3a   : > { %v480_v12 = vpack.c.bf16 %v237_v11, %v236_v10  ;;  %v239_v14 = vld [vmem:[#allocation2 + $0x38] sm:$0xff]  ;;  %s209_s27 = sand.u32 1, %s652_s13   ;;  %v240_v20 = vld [vmem:[%s853_s2] sm:$0xff]  ;;  %s442_s8 = sshll.u32 %s660_s15, 7 }
  0x3b   : > { %s438_s30 = sshll.u32 %s213_s28, 3  ;;  %475 = vmatpush3.bf16.msra.mxu0 %v474_v5  ;;  %v483_v15 = vpack.c.bf16 %v239_v14, %v238_v13  ;;  %s437_s5 = sshll.u32 %s209_s27, 3 }
  0x3c   : > { %s218_s26 = scalar_lea.vmem %s851_s0, %s438_s30  ;;  %476 = vmatprep.subr.bf16.mxu0 %v674_v1  ;;  %s211_s9 = scalar_lea.vmem [#allocation5], %s437_s5 }
  0x3d   : > { %v223_v2 = vld [vmem:[%s218_s26] sm:$0xff]  ;;  %s331_s10 = sshll.u32 %s211_s9, 4  ;;  %s804_s19 = scalar_lea.hbm %s854_s3, %s442_s8  ;;  %s806_s10 = int_to_ptr.vmem [resolvable:$true] %s331_s10 }
  0x3e   : > { %227 = vperm.xlu0 %557, %v223_v2   ;;  %s317_s21 = scalar_lea.sflag [#allocation4], %s209_s27  ;;  %s586_s23 = scalar_lea.vmem %s806_s10, 128 }
  0x3f   : > { %478 = vmatpush3.bf16.msra.mxu0 %v477_v9  ;;  %p587_p8 = scmp.ne.s32.totalorder %s806_s10, %s586_s23  ;;  %p866_p10 = scmp.ne.s32.totalorder %s859_s22, 0 }
  0x40   : > { %479 = vmatprep.subr.bf16.mxu0 %v674_v1  ;;  %s677_s15 = smov [#allocation5]  }
  0x41   : > { %p588_p11 = pnand %p587_p8, %p866_p10  ;;  %s590_s28 = sshll.u32 %s677_s15, 4  ;;  %s591_s28 = int_to_ptr.vmem [resolvable:$false] %s590_s28 }
  0x42   : > { %s592_s30 = scalar_lea.vmem %s591_s28, 256  ;;  %p593_p1 = scmp.lt.s32.totalorder %s806_s10, %s591_s28 }
  0x43   : > { %481 = vmatpush3.bf16.msra.mxu0 %v480_v12  ;;  %p589_p13 = pneg %p588_p11  ;;  %p594_p3 = scmp.lt.s32.totalorder %s592_s30, %s586_s23 }
  0x44   : > { %482 = vmatprep.subr.bf16.mxu0 %v674_v1 }
  0x45   : > { %p595_p5 = por %p594_p3, %p593_p1 }
  0x47   : > { %484 = vmatpush3.bf16.msra.mxu0 %v483_v15  ;;  %p596_p6 = pnand %p595_p5, %p589_p13 }
  0xbd   : > { %v228_v18 = vpop.permute.xlu0 %227 }
  0xbe   : > { %vm229_vm2 = vcmp.eq.s32.totalorder %v228_v18, %v225_v17 }
  0xbf   : > { %v439_v19 = vsel %vm229_vm2, 1.0, %v676_v8 }
  0xc0   : > { %471 = vmatmul.mubr.msk.f32.vlgmr.msra.gmra.mrb[0].mxu0 %vm241_vm1, %v439_v19 }
 0x193   : > { %v311_v21 = vpop.f32.mrb[0].mxu0 }
 0x194   : > { %v312_v22 = vadd.f32 %v311_v21, %v240_v20  ;;  %v472_v23 = vpop.f32.mrb[1].mxu0 }
 0x196   : > { %315 = vst [vmem:[%s211_s9] sm:$0xff] %v312_v22 }
 0x197   : > { %599 = shalt.err (!%p596_p6)
}
 0x198   : > { %s600_s4 = scalar_lea.hbm %s804_s19, 128  ;;  %s604_s27 = scalar_lea.hbm %s854_s3, 256 }
 0x199   : > { %p601_p7 = scmp.ne.s32.totalorder %s804_s19, %s600_s4  ;;  %p605_p0 = scmp.lt.u32.totalorder %s804_s19, %s854_s3 }
 0x19a   : > { %p606_p2 = scmp.lt.u32.totalorder %s604_s27, %s600_s4  ;;  %p608_p8 = scmp.lt.u32.totalorder %s600_s4, %s804_s19 }
 0x19b   : > { %p602_p9 = pnand %p601_p7, %p866_p10 }
 0x19c   : > { %p607_p4 = por %p606_p2, %p605_p0 }
 0x19d   : > { %p603_p12 = pneg %p602_p9 }
 0x19e   : > { %p609_p11 = por %p608_p8, %p607_p4 }
 0x1a0   : > { %p610_p13 = pnand %p609_p11, %p603_p12 }
 0x1a2   : > { %613 = shalt.err (!%p610_p13)
}
 0x1a3   : > { %489 = dma.vmem_to_hbm [thread:$0]  (%p866_p10), %s806_s10, 128, %s804_s19, %s317_s21  }
 0x1a4 PF: > { %p501_p1 = scmp.ge.s32.totalorder %s668_s17, 2  ;;  %s343_s7 = sand.u32 1, %s648_s12  }
 0x1a5   : > { %p867_p3 = scmp.ne.s32.totalorder %s860_s24, 0  ;;  %s344_s8 = scalar_lea.sflag [#allocation4], %s343_s7 }
 0x1a7   : > { %p496_p5 = pnand %p501_p1, %p867_p3 }
 0x1a9   : > { %643 = dma.done.wait (!%p496_p5), %s344_s8, 128  }
 0x1aa   : > { %645 = vsyncadd (!%p496_p5), %s344_s8, 4294967168  ;;  %s17_s17 = sadd.s32 1, %s668_s17   ;;  %s868_s12 = smov %s652_s13 }
 0x1ab   : > { %p14_p6 = scmp.ge.s32.totalorder %s17_s17, 4   ;;  %s869_s13 = smov %s656_s14 }
 0x1ac   : > { %s870_s14 = smov %s751_s25  ;;  %s871_s15 = smov %s664_s16 }
 0x1ad   : > { %s872_s16 = smov %s874_s20  ;;  %16 = sbr.rel (!%p14_p6) target bundleno = 5 (0x5), region = 75 }
 0x1b4   :  { %349 = vsyncpa [#allocation3], 1 }
 0x1b5   :  { %351 = vsyncpa [#allocation3 + $0x1], 1 }
 0x1b6   :  { %352 = vsyncpa [#allocation4], 1 }
 0x1b7   :  { %354 = vsyncpa [#allocation4 + $0x1], 1 }

</bundles_post_ra>
